<compile_context>
chip_gen: v6e
topology: v6e:2x2x1
jax: 0.10.0
libtpu: 0.0.40
codegen_flags: <defaults>
</compile_context>

<pallas_src>
import math
from functools import partial
from typing import NamedTuple

import jax
import jax.numpy as jnp
from jax.experimental import pallas as pl
from jax.experimental.pallas import tpu as pltpu


def _round_up(x, m):
    return (x + m - 1) // m * m


def _pick_tile(total, desired, align):
    """Largest multiple of `align` that divides `total` and is <= desired (>= align)."""
    t = max(align, (min(desired, total) // align) * align)
    while total % t:
        t -= align
    return t


def _device_kind():
    try:
        devs = jax.devices()
        return devs[0].device_kind.lower() if devs else ""
    except Exception:
        return ""


def _vmem_budget(kind):
    """~3/4 of physical VMEM: headroom for compiler internal scratch / semaphores."""
    try:
        cap = int(pltpu.get_tpu_info().vmem_capacity_bytes)
    except Exception:
        cap = (64 if "v7" in kind else 128) * 1024 * 1024
    return int(cap * 3 // 4)


def _default_tm(kind, w_item):
    """Generation-aware row tile so 2*tm/w_item flop/B clears the MXU/HBM crossover."""
    if "v7" in kind:
        return 512                       # crossover ~311 flop/B; bigger just burns 64 MiB VMEM
    if "v6" in kind:
        return 1024                      # crossover ~680 flop/B
    if "v5" in kind:
        return 256 if w_item <= 2 else 512   # crossover ~240 flop/B
    return 512 if w_item <= 2 else 1024


class FFNParams(NamedTuple):
    w1t: jax.Array   # (E_pad, H_pad)  fc1 weight, transposed (+padded, maybe bf16)
    b1: jax.Array    # (1, H_pad)      f32
    w2t: jax.Array   # (H_pad, E_pad)  fc2 weight, transposed (+padded, maybe bf16)
    b2: jax.Array    # (1, E_pad)      f32
    embed: int       # original E
    hidden: int      # original H


def prepare_params(w1, b1, w2, b2, *, weight_dtype=None):
    """One-time transform of PyTorch-layout params (w1: (H, E), w2: (E, H)).

    Transposes, zero-pads lane dims to multiples of 128 and optionally casts the weight
    matrices to a narrower MXU input dtype (e.g. bf16). Done once at parameter-load time."""
    H, E = w1.shape
    E_pad = _round_up(E, 128)
    H_pad = _round_up(H, 128)

    w1t = jnp.pad(w1.T, ((0, E_pad - E), (0, H_pad - H)))          # (E_pad, H_pad)
    w2t = jnp.pad(w2.T, ((0, H_pad - H), (0, E_pad - E)))          # (H_pad, E_pad)
    if weight_dtype is not None:
        w1t = w1t.astype(weight_dtype)
        w2t = w2t.astype(weight_dtype)
    b1p = jnp.pad(b1.astype(jnp.float32), (0, H_pad - H)).reshape(1, H_pad)
    b2p = jnp.pad(b2.astype(jnp.float32), (0, E_pad - E)).reshape(1, E_pad)
    return FFNParams(w1t, b1p, w2t, b2p, E, H)


# ----------------------------------------------------------------------------- kernels

def _ffn_resident_kernel(x_ref, w1_ref, b1_ref, w2_ref, b2_ref, o_ref):
    """Weights fully resident in VMEM; whole H reduction in one step per row tile."""
    mm_dtype = w1_ref.dtype
    x = x_ref[...]
    if x.dtype != mm_dtype:
        x = x.astype(mm_dtype)
    h = jnp.dot(x, w1_ref[...], preferred_element_type=jnp.float32) + b1_ref[...]
    h = jnp.maximum(h, 0.0)                      # ReLU in f32
    # Dropout has p=0.0 (identity / eval semantics).
    # TODO(synk): plumb a pltpu.prng_random_bits-based dropout mask if drop > 0 is needed.
    o_ref[...] = (jnp.dot(h.astype(mm_dtype), w2_ref[...],
                          preferred_element_type=jnp.float32)
                  + b2_ref[...]).astype(o_ref.dtype)


def _ffn_tiled_kernel(x_ref, w1_ref, b1_ref, w2_ref, b2_ref, o_ref, *scratch,
                      acc_in_out, cast_x):
    """h-tiled reduction. acc_in_out: accumulate directly into the (f32) output block.
    cast_x: cast the resident x block to the MXU dtype once (h==0) into a VMEM scratch."""
    idx = 0
    if acc_in_out:
        acc_ref = o_ref
    else:
        acc_ref = scratch[idx]
        idx += 1
    xb_ref = scratch[idx] if cast_x else None

    mm_dtype = w1_ref.dtype
    h_idx = pl.program_id(1)

    @pl.when(h_idx == 0)
    def _init():
        # Fold the second bias into the accumulator init (saves an epilogue VPU add).
        acc_ref[...] = jnp.broadcast_to(b2_ref[...], acc_ref.shape).astype(acc_ref.dtype)
        if cast_x:
            xb_ref[...] = x_ref[...].astype(mm_dtype)   # cast once, reuse across h steps

    x = xb_ref[...] if cast_x else x_ref[...]
    h = jnp.dot(x, w1_ref[...], preferred_element_type=jnp.float32) + b1_ref[...]
    h = jnp.maximum(h, 0.0)                      # ReLU in f32
    # Dropout has p=0.0 (identity / eval semantics).
    acc_ref[...] += jnp.dot(h.astype(mm_dtype), w2_ref[...],
                            preferred_element_type=jnp.float32).astype(acc_ref.dtype)

    if not acc_in_out:
        @pl.when(h_idx == pl.num_programs(1) - 1)
        def _store():
            o_ref[...] = acc_ref[...].astype(o_ref.dtype)


# ----------------------------------------------------------------------------- wrapper

def feed_forward(x, params: FFNParams, *, tm=None, th=512):
    """x: (..., E). Returns fc2(relu(fc1(x))) with PyTorch Linear semantics."""
    orig_shape = x.shape
    E, H = params.embed, params.hidden
    E_pad, H_pad = params.w1t.shape
    assert orig_shape[-1] == E

    out_dtype = x.dtype
    x2d = x.reshape(-1, E)
    M = x2d.shape[0]

    # Keep E-lane zero-padding (padded K columns must hit zero weight rows, never garbage).
    if E_pad != E:
        x2d = jnp.pad(x2d, ((0, 0), (0, E_pad - E)))
    # No M-row padding: partial last row block handled by Pallas OOB write masking.

    x_item = jnp.dtype(x2d.dtype).itemsize
    w_item = jnp.dtype(params.w1t.dtype).itemsize
    out_item = jnp.dtype(out_dtype).itemsize
    mm_dtype = params.w1t.dtype
    mm_item = w_item
    sub = {4: 8, 2: 16, 1: 32}.get(x_item, 8)

    kind = _device_kind()
    budget = _vmem_budget(kind)

    if tm is None:
        tm = _default_tm(kind, w_item)
    tm_eff = max(sub, min((tm // sub) * sub, _round_up(M, sub)))

    # v7x: 2 TensorCores share the 'parallel' row axis -- make sure both get work.
    if "v7" in kind and M > sub and pl.cdiv(M, tm_eff) < 2:
        half = _round_up((M + 1) // 2, sub)
        if pl.cdiv(M, half) >= 2:
            tm_eff = half

    # ---- VMEM footprint estimates (double-buffered streams + scratch + intermediates)
    def resident_bytes(tm_e):
        stream = tm_e * E_pad * (x_item + out_item)
        weights = 2 * E_pad * H_pad * w_item + (H_pad + E_pad) * 4
        interm = tm_e * H_pad * 4
        if mm_item < 4:
            interm += tm_e * H_pad * mm_item
        if x_item != mm_item:
            interm += tm_e * E_pad * mm_item
        return 2 * stream + 2 * weights + interm

    def tiled_bytes(tm_e, th_e, use_acc, use_xb):
        stream = (tm_e * E_pad * x_item + E_pad * th_e * w_item + th_e * 4
                  + th_e * E_pad * w_item + E_pad * 4 + tm_e * E_pad * out_item)
        scr = (tm_e * E_pad * 4 if use_acc else 0) + (tm_e * E_pad * mm_item if use_xb else 0)
        interm = tm_e * th_e * 4
        if mm_item < 4:
            interm += tm_e * th_e * mm_item
        return 2 * stream + scr + interm

    # ---- path selection: weights-resident fast path when W1+W2 (double-buffered) are small
    weights_alloc = 2 * (2 * E_pad * H_pad * w_item)
    use_resident = weights_alloc <= budget // 3
    if use_resident:
        tm_res = tm_eff
        while resident_bytes(tm_res) > budget and tm_res > sub:
            tm_res = max(sub, _round_up(tm_res // 2, sub))
        use_resident = resident_bytes(tm_res) <= budget
        if use_resident:
            tm_eff = tm_res

    io_bytes = M * E_pad * x_item + M * E_pad * out_item
    w_bytes = 2 * E_pad * H_pad * w_item + (H_pad + E_pad) * 4

    if use_resident:
        grid = (pl.cdiv(M, tm_eff),)
        cost = pl.CostEstimate(flops=4 * M * E * H, transcendentals=0,
                               bytes_accessed=io_bytes + w_bytes)
        out2d = pl.pallas_call(
            _ffn_resident_kernel,
            out_shape=jax.ShapeDtypeStruct((M, E_pad), out_dtype),
            grid_spec=pltpu.PrefetchScalarGridSpec(
                num_scalar_prefetch=0,
                grid=grid,
                in_specs=[
                    pl.BlockSpec((tm_eff, E_pad), lambda i: (i, 0)),   # x rows
                    pl.BlockSpec((E_pad, H_pad),  lambda i: (0, 0)),   # W1^T (resident)
                    pl.BlockSpec((1, H_pad),      lambda i: (0, 0)),   # b1
                    pl.BlockSpec((H_pad, E_pad),  lambda i: (0, 0)),   # W2^T (resident)
                    pl.BlockSpec((1, E_pad),      lambda i: (0, 0)),   # b2
                ],
                out_specs=pl.BlockSpec((tm_eff, E_pad), lambda i: (i, 0)),
                scratch_shapes=[],
            ),
            compiler_params=pltpu.CompilerParams(
                dimension_semantics=("parallel",),
                vmem_limit_bytes=int(budget),
            ),
            cost_estimate=cost,
        )(x2d, params.w1t, params.b1, params.w2t, params.b2)
    else:
        th_align = 256 if (H_pad % 256 == 0 and H_pad >= 256) else 128
        th_eff = _pick_tile(H_pad, max(th, th_align), th_align)
        acc_in_out = jnp.dtype(out_dtype) == jnp.dtype(jnp.float32)
        cast_x = jnp.dtype(x2d.dtype) != jnp.dtype(mm_dtype)

        # Shrink tiles (th first, then tm) until the footprint fits the VMEM budget.
        while tiled_bytes(tm_eff, th_eff, not acc_in_out, cast_x) > budget:
            if th_eff > 2 * th_align:
                th_eff = _pick_tile(H_pad, th_eff // 2, th_align)
            elif tm_eff > max(2 * sub, 256):
                tm_eff = max(256, _round_up(tm_eff // 2, sub))
            elif th_eff > th_align:
                th_eff = _pick_tile(H_pad, th_eff // 2, th_align)
            elif tm_eff > sub:
                tm_eff = max(sub, _round_up(tm_eff // 2, sub))
            else:
                break

        scratch_shapes = []
        if not acc_in_out:
            scratch_shapes.append(pltpu.VMEM((tm_eff, E_pad), jnp.float32))
        if cast_x:
            scratch_shapes.append(pltpu.VMEM((tm_eff, E_pad), mm_dtype))

        grid = (pl.cdiv(M, tm_eff), H_pad // th_eff)
        cost = pl.CostEstimate(flops=4 * M * E * H, transcendentals=0,
                               bytes_accessed=io_bytes + grid[0] * w_bytes)

        kernel = partial(_ffn_tiled_kernel, acc_in_out=acc_in_out, cast_x=cast_x)
        out2d = pl.pallas_call(
            kernel,
            out_shape=jax.ShapeDtypeStruct((M, E_pad), out_dtype),
            grid_spec=pltpu.PrefetchScalarGridSpec(
                num_scalar_prefetch=0,
                grid=grid,
                in_specs=[
                    pl.BlockSpec((tm_eff, E_pad), lambda i, h: (i, 0)),   # x rows
                    pl.BlockSpec((E_pad, th_eff), lambda i, h: (0, h)),   # W1^T h-chunk
                    pl.BlockSpec((1, th_eff),     lambda i, h: (0, h)),   # b1 h-chunk
                    pl.BlockSpec((th_eff, E_pad), lambda i, h: (h, 0)),   # W2^T h-chunk
                    pl.BlockSpec((1, E_pad),      lambda i, h: (0, 0)),   # b2
                ],
                out_specs=pl.BlockSpec((tm_eff, E_pad), lambda i, h: (i, 0)),
                scratch_shapes=scratch_shapes,
            ),
            compiler_params=pltpu.CompilerParams(
                dimension_semantics=("parallel", "arbitrary"),
                vmem_limit_bytes=int(budget),
            ),
            cost_estimate=cost,
        )(x2d, params.w1t, params.b1, params.w2t, params.b2)

    if E_pad != E:
        out2d = out2d[:, :E]
    return out2d.reshape(orig_shape)


def init_params(key, embed_size, hidden, dtype=jnp.float32):
    """nn.Linear-style uniform(-1/sqrt(fan_in), 1/sqrt(fan_in)) init, PyTorch layouts."""
    k1, k2, k3, k4 = jax.random.split(key, 4)
    bound1 = 1.0 / math.sqrt(embed_size)
    bound2 = 1.0 / math.sqrt(hidden)
    w1 = jax.random.uniform(k1, (hidden, embed_size), dtype, -bound1, bound1)
    b1 = jax.random.uniform(k2, (hidden,), dtype, -bound1, bound1)
    w2 = jax.random.uniform(k3, (embed_size, hidden), dtype, -bound2, bound2)
    b2 = jax.random.uniform(k4, (embed_size,), dtype, -bound2, bound2)
    return w1, b1, w2, b2


if __name__ == "__main__":
    batch, seq, embed_size, hidden = 2, 8, 32, 64

    key = jax.random.PRNGKey(0)
    kx, kp = jax.random.split(key)
    x = jax.random.normal(kx, (batch, seq, embed_size), jnp.float32)
    w1, b1, w2, b2 = init_params(kp, embed_size, hidden)

    # Pure-JAX reference of the same math (PyTorch FeedForward forward pass, drop=0).
    ref = jnp.maximum(x @ w1.T + b1, 0.0) @ w2.T + b2

    # f32 MXU-input path: matches the f32 reference tightly.
    params_f32 = prepare_params(w1, b1, w2, b2)
    out = jax.block_until_ready(feed_forward(x, params_f32))
    assert out.shape == x.shape
    assert jnp.allclose(out, ref, atol=1e-5, rtol=1e-5)

    # bf16 MXU-input path (f32 accumulation) — the recommended production setting.
    params_bf16 = prepare_params(w1, b1, w2, b2, weight_dtype=jnp.bfloat16)
    out_bf16 = jax.block_until_ready(feed_forward(x, params_bf16))
    assert out_bf16.shape == x.shape
    assert jnp.allclose(out_bf16, ref, atol=1e-1, rtol=1e-1)

    # Exercise the h-tiled (non-resident) path too, with a larger row count.
    xb = jax.random.normal(kx, (8, 64, embed_size), jnp.float32)
    refb = jnp.maximum(xb @ w1.T + b1, 0.0) @ w2.T + b2
    outb = jax.block_until_ready(feed_forward(xb, params_bf16, tm=128, th=128))
    assert jnp.allclose(outb, refb, atol=1e-1, rtol=1e-1)

    print("KERNEL_OK")
</pallas_src>

<mosaic_0001>
module attributes {stable_mosaic.version = 11 : i64} {
  func.func @_ffn_resident_kernel(%arg0: i32, %arg1: memref<16x128xf32, #tpu.memory_space<vmem>>, %arg2: memref<128x128xf32, #tpu.memory_space<vmem>>, %arg3: memref<1x128xf32, #tpu.memory_space<vmem>>, %arg4: memref<128x128xf32, #tpu.memory_space<vmem>>, %arg5: memref<1x128xf32, #tpu.memory_space<vmem>>, %arg6: memref<16x128xf32, #tpu.memory_space<vmem>>) attributes {dimension_semantics = [#tpu.dimension_semantics<parallel>], iteration_bounds = array<i64: 1>, scalar_prefetch = 0 : i64, scratch_operands = 0 : i64, tpu.core_type = #tpu.core_type<tc>, window_params = [{transform_indices = @transform_0, window_bounds = array<i64: 16, 128>}, {pipeline_mode = #tpu.pipeline_mode<synchronous>, transform_indices = @transform_1, window_bounds = array<i64: 128, 128>}, {pipeline_mode = #tpu.pipeline_mode<synchronous>, transform_indices = @transform_2, window_bounds = array<i64: 1, 128>}, {pipeline_mode = #tpu.pipeline_mode<synchronous>, transform_indices = @transform_3, window_bounds = array<i64: 128, 128>}, {pipeline_mode = #tpu.pipeline_mode<synchronous>, transform_indices = @transform_4, window_bounds = array<i64: 1, 128>}, {transform_indices = @transform_5, window_bounds = array<i64: 16, 128>}]} {
    %c0 = arith.constant 0 : index
    %c0_0 = arith.constant 0 : index
    %0 = vector.load %arg1[%c0, %c0_0] : memref<16x128xf32, #tpu.memory_space<vmem>>, vector<16x128xf32>
    %c0_1 = arith.constant 0 : index
    %c0_2 = arith.constant 0 : index
    %1 = vector.load %arg2[%c0_1, %c0_2] : memref<128x128xf32, #tpu.memory_space<vmem>>, vector<128x128xf32>
    %cst = arith.constant dense<0.000000e+00> : vector<16x128xf32>
    %2 = tpu.matmul %0, %1, %cst {dimension_numbers = #tpu.dot_dimension_numbers<[1], [0], [0], [1], [0, 0, 1, 1], [], []>} : vector<16x128xf32>, vector<128x128xf32>, vector<16x128xf32> -> vector<16x128xf32>
    %c0_3 = arith.constant 0 : index
    %c0_4 = arith.constant 0 : index
    %3 = vector.load %arg3[%c0_3, %c0_4] : memref<1x128xf32, #tpu.memory_space<vmem>>, vector<1x128xf32>
    %4 = vector.broadcast %3 : vector<1x128xf32> to vector<16x128xf32>
    %5 = arith.addf %2, %4 : vector<16x128xf32>
    %cst_5 = arith.constant 0.000000e+00 : f32
    %6 = vector.broadcast %cst_5 : f32 to vector<16x128xf32>
    %7 = arith.maximumf %5, %6 : vector<16x128xf32>
    %c0_6 = arith.constant 0 : index
    %c0_7 = arith.constant 0 : index
    %8 = vector.load %arg4[%c0_6, %c0_7] : memref<128x128xf32, #tpu.memory_space<vmem>>, vector<128x128xf32>
    %cst_8 = arith.constant dense<0.000000e+00> : vector<16x128xf32>
    %9 = tpu.matmul %7, %8, %cst_8 {dimension_numbers = #tpu.dot_dimension_numbers<[1], [0], [0], [1], [0, 0, 1, 1], [], []>} : vector<16x128xf32>, vector<128x128xf32>, vector<16x128xf32> -> vector<16x128xf32>
    %c0_9 = arith.constant 0 : index
    %c0_10 = arith.constant 0 : index
    %10 = vector.load %arg5[%c0_9, %c0_10] : memref<1x128xf32, #tpu.memory_space<vmem>>, vector<1x128xf32>
    %11 = vector.broadcast %10 : vector<1x128xf32> to vector<16x128xf32>
    %12 = arith.addf %9, %11 : vector<16x128xf32>
    %c0_11 = arith.constant 0 : index
    %c0_12 = arith.constant 0 : index
    %13 = vector.load %arg6[%c0_11, %c0_12] : memref<16x128xf32, #tpu.memory_space<vmem>>, vector<16x128xf32>
    tpu.vector_store %arg6[%c0_11, %c0_12], %12 {strides = array<i32>} : memref<16x128xf32, #tpu.memory_space<vmem>>, vector<16x128xf32>,
    return
  }
  func.func @transform_0(%arg0: i32) -> (i32, i32) {
    %c0_i32 = arith.constant 0 : i32
    %c0_i32_0 = arith.constant 0 : i32
    return %arg0, %c0_i32 : i32, i32
  }
  func.func @transform_1(%arg0: i32) -> (i32, i32) {
    %c0_i32 = arith.constant 0 : i32
    %c0_i32_0 = arith.constant 0 : i32
    %c0_i32_1 = arith.constant 0 : i32
    return %c0_i32, %c0_i32_0 : i32, i32
  }
  func.func @transform_2(%arg0: i32) -> (i32, i32) {
    %c0_i32 = arith.constant 0 : i32
    %c0_i32_0 = arith.constant 0 : i32
    %c0_i32_1 = arith.constant 0 : i32
    return %c0_i32, %c0_i32_0 : i32, i32
  }
  func.func @transform_3(%arg0: i32) -> (i32, i32) {
    %c0_i32 = arith.constant 0 : i32
    %c0_i32_0 = arith.constant 0 : i32
    %c0_i32_1 = arith.constant 0 : i32
    return %c0_i32, %c0_i32_0 : i32, i32
  }
  func.func @transform_4(%arg0: i32) -> (i32, i32) {
    %c0_i32 = arith.constant 0 : i32
    %c0_i32_0 = arith.constant 0 : i32
    %c0_i32_1 = arith.constant 0 : i32
    return %c0_i32, %c0_i32_0 : i32, i32
  }
  func.func @transform_5(%arg0: i32) -> (i32, i32) {
    %c0_i32 = arith.constant 0 : i32
    %c0_i32_0 = arith.constant 0 : i32
    return %arg0, %c0_i32 : i32, i32
  }
}

</mosaic_0001>

<bundles_post_ra>
// kernel: tpu_custom_call.1
= control target key start
LH: loop header
LB: loop body
LE: loop exit
PB: predicated region body
PF: predicated region fallthrough
CT: control target
= control target key end

     0   :  { %10 = vsyncpa [#allocation3], 0  ;;  %s548_s0 = inlined_call_operand.hbm [shape: f32[16,128], index: 0, kind: input, shape index: {}]   ;;  %s549_s1 = inlined_call_operand.hbm [shape: f32[128,128], index: 1, kind: input, shape index: {}]   ;;  %s550_s2 = inlined_call_operand.vmem [shape: f32[1,128], index: 2, kind: input, shape index: {}]   ;;  %s551_s3 = inlined_call_operand.hbm [shape: f32[128,128], index: 3, kind: input, shape index: {}]   ;;  %s552_s4 = inlined_call_operand.vmem [shape: f32[1,128], index: 4, kind: input, shape index: {}]   ;;  %s553_s5 = inlined_call_operand.hbm [shape: f32[16,128], index: 5, kind: output, shape index: {}]  }
   0x1   :  { %11 = vsyncpa [#allocation6], 0 }
   0x2   :  { %12 = vsyncpa [#allocation4], 0  ;;  %s482_s18 = smov [#allocation5]   ;;  %s483_s20 = smov [#allocation2]  }
   0x3   :  { %s30_s19 = sshll.u32 %s482_s18, 4  ;;  %s18_s21 = sshll.u32 %s483_s20, 4  ;;  %s31_s19 = int_to_ptr.vmem [resolvable:$true] %s30_s19  ;;  %s19_s21 = int_to_ptr.vmem [resolvable:$true] %s18_s21 }
   0x4   :  { %s404_s22 = scalar_lea.vmem %s31_s19, 2048  ;;  %p409_p1 = scmp.lt.s32.totalorder %s31_s19, %s31_s19 }
   0x5   :  { %p405_p0 = scmp.ne.s32.totalorder %s31_s19, %s404_s22  ;;  %p410_p2 = scmp.lt.s32.totalorder %s404_s22, %s404_s22 }
   0x7   :  { %p411_p3 = por %p410_p2, %p409_p1 }
   0x9   :  { %p412_p4 = pnand %p411_p3, %p405_p0 }
   0xb   :  { %415 = shalt.err (!%p412_p4)
}
   0xc   :  { %s484_s23 = smov 128   ;;  %s485_s24 = smov 8  }
   0xd   :  { %36 = dma.hbm_to_vmem [thread:$0]  %s549_s1, 2048, %s31_s19, [#allocation6], %s484_s23, %s484_s23, %s485_s24  }
   0xe   :  { %s424_s27 = scalar_lea.vmem %s19_s21, 256  ;;  %p429_p6 = scmp.lt.s32.totalorder %s19_s21, %s19_s21 }
   0xf   :  { %p425_p5 = scmp.ne.s32.totalorder %s19_s21, %s424_s27  ;;  %p430_p7 = scmp.lt.s32.totalorder %s424_s27, %s424_s27 }
  0x11   :  { %p431_p8 = por %p430_p7, %p429_p6 }
  0x13   :  { %p432_p9 = pnand %p431_p8, %p425_p5 }
  0x15   :  { %435 = shalt.err (!%p432_p9)
}
  0x16   :  { %24 = dma.hbm_to_vmem [thread:$0]  %s548_s0, 256, %s19_s21, [#allocation3], %s484_s23, %s484_s23, %s485_s24  }
  0x17   :  { %s486_s30 = smov [#allocation7]  }
  0x18   :  { %s44_s6 = sshll.u32 %s486_s30, 4  ;;  %s45_s6 = int_to_ptr.vmem [resolvable:$true] %s44_s6 }
  0x19   :  { %s444_s7 = scalar_lea.vmem %s45_s6, 2048  ;;  %p449_p11 = scmp.lt.s32.totalorder %s45_s6, %s45_s6 }
  0x1a   :  { %p445_p10 = scmp.ne.s32.totalorder %s45_s6, %s444_s7  ;;  %p450_p12 = scmp.lt.s32.totalorder %s444_s7, %s444_s7 }
  0x1c   :  { %p451_p13 = por %p450_p12, %p449_p11 }
  0x1e   :  { %p452_p0 = pnand %p451_p13, %p445_p10 }
  0x20   :  { %455 = shalt.err (!%p452_p0)
}
  0x21   :  { %50 = dma.hbm_to_vmem [thread:$0]  %s551_s3, 2048, %s45_s6, [#allocation6], %s484_s23, %s484_s23, %s485_s24  }
  0x22   :  { %476 = dma.done.wait [#allocation3], 256  }
  0x23   :  { %477 = vsyncadd [#allocation3], 4294967040 }
  0x24   :  { %478 = dma.done.wait [#allocation6], 4096  }
  0x25   :  { %479 = vsyncadd [#allocation6], 4294963200  ;;  %v79_v0 = vld [vmem:[#allocation5 + $0x78] sm:$0xff]  ;;  %v78_v1 = vld [vmem:[#allocation5 + $0x70] sm:$0xff]  ;;  %s487_s11 = smov [#allocation8]  }
  0x26   :  { %320 = vmatprep.subr.mxu0 %v79_v0  ;;  %v77_v2 = vld [vmem:[#allocation5 + $0x68] sm:$0xff]  ;;  %v76_v3 = vld [vmem:[#allocation5 + $0x60] sm:$0xff]  ;;  %v62_v4 = vld [vmem:[#allocation2] sm:$0xff]  ;;  %s269_s12 = sshll.u32 %s487_s11, 4  ;;  %s270_s12 = int_to_ptr.vmem [resolvable:$true] %s269_s12 }
  0x27   :  { %321 = vmatpush3.msra.mxu0 %v79_v0  ;;  %v75_v5 = vld [vmem:[#allocation5 + $0x58] sm:$0xff]  ;;  %352 = vmatprep.mubr.f32.mxu0 %v62_v4  ;;  %v178_v7 = vld [vmem:[#allocation7 + $0x70] sm:$0xff]  ;;  %v177_v9 = vld [vmem:[#allocation7 + $0x68] sm:$0xff]  ;;  %p461_p2 = scmp.lt.s32.totalorder %s270_s12, %s270_s12 }
  0x28   :  { %322 = vmatprep.subr.mxu0 %v78_v1  ;;  %v179_v6 = vld [vmem:[#allocation7 + $0x78] sm:$0xff]  ;;  %v74_v8 = vld [vmem:[#allocation5 + $0x50] sm:$0xff]  ;;  %v73_v10 = vld [vmem:[#allocation5 + $0x48] sm:$0xff] }
  0x29   :  { %323 = vmatpush3.msra.mxu0 %v78_v1  ;;  %355 = vmatprep.subr.mxu1 %v179_v6  ;;  %v176_v11 = vld [vmem:[#allocation7 + $0x60] sm:$0xff]  ;;  %v175_v13 = vld [vmem:[#allocation7 + $0x58] sm:$0xff]  ;;  %v174_v15 = vld [vmem:[#allocation7 + $0x50] sm:$0xff] }
  0x2a   :  { %324 = vmatprep.subr.mxu0 %v77_v2  ;;  %356 = vmatpush3.msra.mxu1 %v179_v6  ;;  %v72_v12 = vld [vmem:[#allocation5 + $0x40] sm:$0xff]  ;;  %v71_v14 = vld [vmem:[#allocation5 + $0x38] sm:$0xff]  ;;  %v70_v16 = vld [vmem:[#allocation5 + $0x30] sm:$0xff] }
  0x2b   :  { %325 = vmatpush3.msra.mxu0 %v77_v2  ;;  %357 = vmatprep.subr.mxu1 %v178_v7  ;;  %v173_v17 = vld [vmem:[#allocation7 + $0x48] sm:$0xff]  ;;  %v172_v19 = vld [vmem:[#allocation7 + $0x40] sm:$0xff]  ;;  %v171_v21 = vld [vmem:[#allocation7 + $0x38] sm:$0xff] }
  0x2c   :  { %326 = vmatprep.subr.mxu0 %v76_v3  ;;  %358 = vmatpush3.msra.mxu1 %v178_v7  ;;  %v69_v18 = vld [vmem:[#allocation5 + $0x28] sm:$0xff]  ;;  %v68_v20 = vld [vmem:[#allocation5 + $0x20] sm:$0xff]  ;;  %v67_v22 = vld [vmem:[#allocation5 + $0x18] sm:$0xff] }
  0x2d   :  { %327 = vmatpush3.msra.mxu0 %v76_v3  ;;  %359 = vmatprep.subr.mxu1 %v177_v9  ;;  %v170_v23 = vld [vmem:[#allocation7 + $0x30] sm:$0xff]  ;;  %v169_v25 = vld [vmem:[#allocation7 + $0x28] sm:$0xff]  ;;  %v168_v27 = vld [vmem:[#allocation7 + $0x20] sm:$0xff] }
  0x2e   :  { %328 = vmatprep.subr.mxu0 %v75_v5  ;;  %360 = vmatpush3.msra.mxu1 %v177_v9  ;;  %v66_v24 = vld [vmem:[#allocation5 + $0x10] sm:$0xff]  ;;  %v65_v26 = vld [vmem:[#allocation5 + $0x8] sm:$0xff]  ;;  %v64_v28 = vld [vmem:[#allocation5] sm:$0xff] }
  0x2f   :  { %329 = vmatpush3.msra.mxu0 %v75_v5  ;;  %361 = vmatprep.subr.mxu1 %v176_v11  ;;  %v63_v29 = vld [vmem:[#allocation2 + $0x8] sm:$0xff]  ;;  %v166_v31 = vld [vmem:[#allocation7 + $0x10] sm:$0xff]  ;;  %v165_v32 = vld [vmem:[#allocation7 + $0x8] sm:$0xff] }
  0x30   :  { %330 = vmatprep.subr.mxu0 %v74_v8  ;;  %362 = vmatpush3.msra.mxu1 %v176_v11  ;;  %v167_v30 = vld [vmem:[#allocation7 + $0x18] sm:$0xff]  ;;  %v164_v33 = vld [vmem:[#allocation7] sm:$0xff]  ;;  %v282_v34 = vld [vmem:[%s550_s2] ss:$0 sm:$0xff]  ;;  %s456_s2 = scalar_lea.vmem %s270_s12, 256 }
  0x31   :  { %331 = vmatpush3.msra.mxu0 %v74_v8  ;;  %363 = vmatprep.subr.mxu1 %v175_v13  ;;  %v283_v41 = vld [vmem:[%s552_s4] ss:$0 sm:$0xff]  ;;  %p457_p1 = scmp.ne.s32.totalorder %s270_s12, %s456_s2  ;;  %p462_p3 = scmp.lt.s32.totalorder %s456_s2, %s456_s2 }
  0x32   :  { %332 = vmatprep.subr.mxu0 %v73_v10  ;;  %364 = vmatpush3.msra.mxu1 %v175_v13 }
  0x33   :  { %333 = vmatpush3.msra.mxu0 %v73_v10  ;;  %365 = vmatprep.subr.mxu1 %v174_v15  ;;  %p463_p4 = por %p462_p3, %p461_p2 }
  0x34   :  { %334 = vmatprep.subr.mxu0 %v72_v12  ;;  %366 = vmatpush3.msra.mxu1 %v174_v15 }
  0x35   :  { %335 = vmatpush3.msra.mxu0 %v72_v12  ;;  %367 = vmatprep.subr.mxu1 %v173_v17  ;;  %p464_p5 = pnand %p463_p4, %p457_p1 }
  0x36   :  { %336 = vmatprep.subr.mxu0 %v71_v14  ;;  %368 = vmatpush3.msra.mxu1 %v173_v17 }
  0x37   :  { %337 = vmatpush3.msra.mxu0 %v71_v14  ;;  %369 = vmatprep.subr.mxu1 %v172_v19 }
  0x38   :  { %338 = vmatprep.subr.mxu0 %v70_v16  ;;  %370 = vmatpush3.msra.mxu1 %v172_v19 }
  0x39   :  { %339 = vmatpush3.msra.mxu0 %v70_v16  ;;  %371 = vmatprep.subr.mxu1 %v171_v21 }
  0x3a   :  { %340 = vmatprep.subr.mxu0 %v69_v18  ;;  %372 = vmatpush3.msra.mxu1 %v171_v21 }
  0x3b   :  { %341 = vmatpush3.msra.mxu0 %v69_v18  ;;  %373 = vmatprep.subr.mxu1 %v170_v23 }
  0x3c   :  { %342 = vmatprep.subr.mxu0 %v68_v20  ;;  %374 = vmatpush3.msra.mxu1 %v170_v23 }
  0x3d   :  { %343 = vmatpush3.msra.mxu0 %v68_v20  ;;  %375 = vmatprep.subr.mxu1 %v169_v25 }
  0x3e   :  { %344 = vmatprep.subr.mxu0 %v67_v22  ;;  %376 = vmatpush3.msra.mxu1 %v169_v25 }
  0x3f   :  { %345 = vmatpush3.msra.mxu0 %v67_v22  ;;  %377 = vmatprep.subr.mxu1 %v168_v27 }
  0x40   :  { %346 = vmatprep.subr.mxu0 %v66_v24  ;;  %378 = vmatpush3.msra.mxu1 %v168_v27 }
  0x41   :  { %347 = vmatpush3.msra.mxu0 %v66_v24  ;;  %379 = vmatprep.subr.mxu1 %v167_v30 }
  0x42   :  { %348 = vmatprep.subr.mxu0 %v65_v26  ;;  %380 = vmatpush3.msra.mxu1 %v167_v30 }
  0x43   :  { %349 = vmatpush3.msra.mxu0 %v65_v26  ;;  %381 = vmatprep.subr.mxu1 %v166_v31 }
  0x44   :  { %350 = vmatprep.subr.mxu0 %v64_v28  ;;  %382 = vmatpush3.msra.mxu1 %v166_v31 }
  0x45   :  { %351 = vmatpush3.msra.mxu0 %v64_v28  ;;  %383 = vmatprep.subr.mxu1 %v165_v32 }
  0x46   :  { %353 = vmatmul.mubr.f32.vlgmr.msra.gmra.mxu0 %v63_v29  ;;  %384 = vmatpush3.msra.mxu1 %v165_v32 }
  0x47   :  { %385 = vmatprep.subr.mxu1 %v164_v33 }
  0x48   :  { %386 = vmatpush3.msra.mxu1 %v164_v33 }
 0x106   :  { %v354_v35 = vpop.f32.mrf.mxu0 }
 0x107   :  { %v159_v36 = vadd.f32 %v354_v35, %v282_v34 }
 0x108   :  { %v153_v37 = vpop.f32.mrf.mxu0 }
 0x109   :  { %v154_v38 = vadd.f32 %v282_v34, %v153_v37  ;;  %v163_v40 = vmax.f32 %v159_v36, 0.0 }
 0x10b   :  { %v162_v39 = vmax.f32 %v154_v38, 0.0 }
 0x10d   :  { %387 = vmatprep.mubr.f32.mxu1 %v162_v39 }
 0x10e   :  { %388 = vmatmul.mubr.f32.vlgmr.msra.gmra.mxu1 %v163_v40 }
 0x1ce   :  { %v389_v42 = vpop.f32.mrf.mxu1 }
 0x1cf   :  { %v259_v43 = vadd.f32 %v389_v42, %v283_v41 }
 0x1d0   :  { %v253_v44 = vpop.f32.mrf.mxu1 }
 0x1d1   :  { %263 = vst [vmem:[#allocation8 + $0x8] sm:$0xff] %v259_v43  ;;  %v254_v45 = vadd.f32 %v283_v41, %v253_v44 }
 0x1d3   :  { %262 = vst [vmem:[#allocation8] sm:$0xff] %v254_v45 }
 0x1d4   :  { %467 = shalt.err (!%p464_p5)
}
 0x1d5   :  { %275 = dma.vmem_to_hbm [thread:$0]  %s270_s12, 256, %s553_s5, [#allocation4], %s484_s23, %s484_s23, %s485_s24  }
 0x1d6   :  { %480 = dma.done.wait [#allocation4], 256  }
 0x1d7   :  { %481 = vsyncadd [#allocation4], 4294967040 }
 0x1d8   :  { %279 = vsyncpa [#allocation3], 1 }
 0x1d9   :  { %280 = vsyncpa [#allocation6], 1 }
 0x1da   :  { %281 = vsyncpa [#allocation4], 1 }

</bundles_post_ra>
